<compile_context>
chip_gen: v7x
topology: tpu7x:2x2x1
jax: 0.10.0
libtpu: 0.0.40
codegen_flags: <defaults>
</compile_context>

<pallas_src>
import jax
import jax.numpy as jnp
from jax.experimental import pallas as pl
from jax.experimental.pallas import tpu as pltpu


def _reduce_kernel(x_ref, w_ref, b_ref, y_ref, acc_ref):
    """grid = (N, T): n = batch image (parallel), j = spatial tile (arbitrary).

    x_ref   : (1, Cin, THW)   input chunk (native dtype)
    w_ref   : (Cout, Cin)     1x1 conv weight with BN scale and 1/HW folded in
    b_ref   : (Cout, 1)       folded BN bias (f32)
    y_ref   : (1, Cout, 1)    pooled+conv+BN+ReLU result, resident across j
    acc_ref : (Cin, 128)      f32 partial-sum scratch (persists across j)
    """
    j = pl.program_id(1)

    @pl.when(j == 0)
    def _():
        acc_ref[...] = jnp.zeros_like(acc_ref)

    # Partial spatial sum: accumulate the 128-wide lane chunks of this grid
    # step in a traced local value (vregs), then do a single accumulator RMW.
    thw = x_ref.shape[2]
    s = x_ref[0, :, 0:128].astype(jnp.float32)
    for c in range(1, thw // 128):
        s = s + x_ref[0, :, c * 128:(c + 1) * 128].astype(jnp.float32)
    acc_ref[...] += s

    @pl.when(j == pl.num_programs(1) - 1)
    def _():
        # One cross-lane (XLU) reduce per image, outside the hot loop.
        pooled = jnp.sum(acc_ref[...], axis=1, keepdims=True)            # (Cin, 1)
        # 1x1 conv (BN scale and 1/HW already folded into w) + bias + ReLU.
        # O(Cout*Cin) once per image -- negligible vs. the HBM streams.
        y = jnp.dot(w_ref[...].astype(jnp.float32), pooled,
                    preferred_element_type=jnp.float32)                  # (Cout, 1)
        y_ref[0] = jnp.maximum(y + b_ref[...], 0.0)


def _broadcast_kernel(y_ref, o_ref):
    """grid = (N, Tb), both parallel.  Bilinear upsample of a 1x1 map
    (align_corners=True) == broadcast of the per-channel value.

    y_ref : (1, Cout, 1)    pooled/activated vector (f32)
    o_ref : (1, Cout, TBC)  lane-dense output tile
    """
    o_ref[0] = jnp.broadcast_to(y_ref[0], o_ref.shape[1:]).astype(o_ref.dtype)


def _pick_spatial_tile(hw128, max_tile, bytes_per_lane, vmem_budget):
    """Pick a lane tile: multiple of 128, <= max_tile, whose double-buffered
    block fits `vmem_budget`; then split hw128 into near-equal 128-multiple
    tiles (pads only up to ~128 lanes per tile instead of up to a full tile)."""
    cap = max(128, (vmem_budget // max(1, 2 * bytes_per_lane)) // 128 * 128)
    tile = max(128, min(max_tile, hw128, cap))
    n_tiles = pl.cdiv(hw128, tile)
    tile = pl.cdiv(hw128 // 128, n_tiles) * 128
    return tile, n_tiles, n_tiles * tile


def _vmem_limit(needed_bytes):
    """Derive vmem_limit_bytes from actual buffer sizes, capped per generation."""
    try:
        cap = int(pltpu.get_tpu_info().vmem_capacity_bytes) - (8 << 20)
    except Exception:
        cap = 56 << 20  # v7x-safe fallback (64 MiB physical per TC)
    cap = max(cap, 16 << 20)
    return min(cap, max(32 << 20, int(needed_bytes * 1.5) + (2 << 20)))


def aspp_pooling(x, conv_w, bn_gamma, bn_beta, bn_mean, bn_var, eps=1e-5,
                 max_tile_hw=2048, max_bcast_tile_hw=4096):
    """x: (N, Cin, H, W) -> (N, Cout, H, W).  conv_w: (Cout, Cin[,1,1])."""
    N, Cin, H, W = x.shape
    Cout = conv_w.shape[0]
    HW = H * W
    in_bytes = x.dtype.itemsize

    # Fold eval-mode BatchNorm and the 1/HW mean normalization into the conv:
    #   scale = gamma / sqrt(var + eps)
    #   W'    = scale * W / HW      (kernel feeds it the raw spatial sum)
    #   b     = beta - mean * scale
    scale = bn_gamma / jnp.sqrt(bn_var + eps)
    w_folded = (conv_w.reshape(Cout, Cin) * scale[:, None] / HW).astype(x.dtype)
    bias = (bn_beta - bn_mean * scale).reshape(Cout, 1).astype(jnp.float32)

    hw128 = pl.cdiv(HW, 128) * 128

    # ---- Phase 1: global average pool + 1x1 conv + BN + ReLU -> (N, Cout, 1).
    thw, n_hw_tiles, hw_pad = _pick_spatial_tile(
        hw128, max_tile_hw, Cin * in_bytes, vmem_budget=24 << 20)

    x_flat = x.reshape(N, Cin, HW)
    if hw_pad != HW:
        # Zero padding does not perturb the sum; 1/HW is folded into W'.
        x_flat = jnp.pad(x_flat, ((0, 0), (0, 0), (0, hw_pad - HW)))

    reduce_vmem = (2 * Cin * thw * in_bytes          # double-buffered input
                   + 2 * Cout * Cin * in_bytes       # folded weight
                   + 4 * Cout * 128 * 4              # bias + pooled out (lane-padded)
                   + Cin * 128 * 4)                  # accumulator scratch

    pooled = pl.pallas_call(
        _reduce_kernel,
        out_shape=jax.ShapeDtypeStruct((N, Cout, 1), jnp.float32),
        grid_spec=pltpu.PrefetchScalarGridSpec(
            num_scalar_prefetch=0,
            grid=(N, n_hw_tiles),
            in_specs=[
                pl.BlockSpec((1, Cin, thw), lambda n, j: (n, 0, j)),
                pl.BlockSpec((Cout, Cin), lambda n, j: (0, 0)),
                pl.BlockSpec((Cout, 1), lambda n, j: (0, 0)),
            ],
            # Constant block index across j -> tiny resident per-image output,
            # written once after the last spatial tile.
            out_specs=pl.BlockSpec((1, Cout, 1), lambda n, j: (n, 0, 0)),
            scratch_shapes=[pltpu.VMEM((Cin, 128), jnp.float32)],
        ),
        compiler_params=pltpu.CompilerParams(
            dimension_semantics=("parallel", "arbitrary"),
            vmem_limit_bytes=_vmem_limit(reduce_vmem),
        ),
    )(x_flat, w_folded, bias)

    # ---- Phase 2: broadcast == bilinear upsample of a 1x1 map (align_corners).
    tbc, n_bc_tiles, hw_bc_pad = _pick_spatial_tile(
        hw128, max_bcast_tile_hw, Cout * in_bytes, vmem_budget=24 << 20)

    bcast_vmem = 2 * Cout * tbc * in_bytes + 2 * Cout * 128 * 4

    out_flat = pl.pallas_call(
        _broadcast_kernel,
        out_shape=jax.ShapeDtypeStruct((N, Cout, hw_bc_pad), x.dtype),
        grid_spec=pltpu.PrefetchScalarGridSpec(
            num_scalar_prefetch=0,
            grid=(N, n_bc_tiles),
            in_specs=[pl.BlockSpec((1, Cout, 1), lambda n, j: (n, 0, 0))],
            out_specs=pl.BlockSpec((1, Cout, tbc), lambda n, j: (n, 0, j)),
        ),
        compiler_params=pltpu.CompilerParams(
            # Disjoint output tiles, no carried state: both axes parallel so
            # the second v7x TensorCore has work even when N == 1.
            dimension_semantics=("parallel", "parallel"),
            vmem_limit_bytes=_vmem_limit(bcast_vmem),
        ),
    )(pooled)

    if hw_bc_pad != HW:
        out_flat = out_flat[:, :, :HW]
    return out_flat.reshape(N, Cout, H, W)


def _reference(x, conv_w, bn_gamma, bn_beta, bn_mean, bn_var, eps=1e-5):
    # Pure-JAX reference of the same forward pass (for a sanity check).
    pooled = jnp.mean(x, axis=(2, 3))                       # (N, Cin)
    y = pooled @ conv_w.reshape(conv_w.shape[0], -1).T      # (N, Cout)
    y = (y - bn_mean) / jnp.sqrt(bn_var + eps) * bn_gamma + bn_beta
    y = jnp.maximum(y, 0.0)
    return jnp.broadcast_to(y[:, :, None, None], y.shape + x.shape[2:])


if __name__ == "__main__":
    key = jax.random.PRNGKey(0)
    k_x, k_w, k_g, k_b, k_m, k_v = jax.random.split(key, 6)

    N, Cin, Cout, H, W = 2, 4, 4, 16, 16
    x = jax.random.normal(k_x, (N, Cin, H, W), dtype=jnp.float32)

    # Deterministic synthetic parameters (1x1 conv weight + BN stats/affine).
    conv_w = jax.random.normal(k_w, (Cout, Cin, 1, 1), dtype=jnp.float32) * 0.1
    bn_gamma = 1.0 + 0.1 * jax.random.normal(k_g, (Cout,), dtype=jnp.float32)
    bn_beta = 0.1 * jax.random.normal(k_b, (Cout,), dtype=jnp.float32)
    bn_mean = 0.05 * jax.random.normal(k_m, (Cout,), dtype=jnp.float32)
    bn_var = jnp.abs(1.0 + 0.1 * jax.random.normal(k_v, (Cout,), dtype=jnp.float32))

    out = aspp_pooling(x, conv_w, bn_gamma, bn_beta, bn_mean, bn_var)
    out = jax.block_until_ready(out)

    ref = _reference(x, conv_w, bn_gamma, bn_beta, bn_mean, bn_var)
    assert out.shape == (N, Cout, H, W)
    assert jnp.allclose(out, ref, atol=1e-5, rtol=1e-5), "mismatch vs reference"

    print("KERNEL_OK")
</pallas_src>

<mosaic_0001>
module attributes {stable_mosaic.version = 11 : i64} {
  func.func @_reduce_kernel(%arg0: i32, %arg1: i32, %arg2: memref<1x4x256xf32, #tpu.memory_space<vmem>>, %arg3: memref<4x4xf32, #tpu.memory_space<vmem>>, %arg4: memref<4x1xf32, #tpu.memory_space<vmem>>, %arg5: memref<1x4x1xf32, #tpu.memory_space<vmem>>, %arg6: memref<4x128xf32, #tpu.memory_space<vmem>>) attributes {dimension_semantics = [#tpu.dimension_semantics<parallel>, #tpu.dimension_semantics<arbitrary>], iteration_bounds = array<i64: 2, 1>, scalar_prefetch = 0 : i64, scratch_operands = 1 : i64, tpu.core_type = #tpu.core_type<tc>, window_params = [{transform_indices = @transform_0, window_bounds = array<i64: 1, 4, 256>}, {pipeline_mode = #tpu.pipeline_mode<synchronous>, transform_indices = @transform_1, window_bounds = array<i64: 4, 4>}, {pipeline_mode = #tpu.pipeline_mode<synchronous>, transform_indices = @transform_2, window_bounds = array<i64: 4, 1>}, {transform_indices = @transform_3, window_bounds = array<i64: 1, 4, 1>}]} {
    %c0_i32 = arith.constant 0 : i32
    %0 = arith.cmpi eq, %arg1, %c0_i32 : i32
    %1 = arith.extui %0 : i1 to i32
    %c0_i32_0 = arith.constant 0 : i32
    %2 = arith.cmpi ne, %1, %c0_i32_0 : i32
    scf.if %2 {
      %cst = arith.constant 0.000000e+00 : f32
      %14 = vector.broadcast %cst : f32 to vector<4x128xf32>
      %c0_11 = arith.constant 0 : index
      %c0_12 = arith.constant 0 : index
      %15 = vector.load %arg6[%c0_11, %c0_12] : memref<4x128xf32, #tpu.memory_space<vmem>>, vector<4x128xf32>
      tpu.vector_store %arg6[%c0_11, %c0_12], %14 {strides = array<i32>} : memref<4x128xf32, #tpu.memory_space<vmem>>, vector<4x128xf32>,
    } else {
    }
    %c0 = arith.constant 0 : index
    %c0_1 = arith.constant 0 : index
    %c0_2 = arith.constant 0 : index
    %3 = vector.load %arg2[%c0, %c0_1, %c0_2] : memref<1x4x256xf32, #tpu.memory_space<vmem>>, vector<1x4x128xf32>
    %4 = vector.shape_cast %3 : vector<1x4x128xf32> to vector<4x128xf32>
    %c0_3 = arith.constant 0 : index
    %c0_4 = arith.constant 0 : index
    %c128 = arith.constant 128 : index
    %5 = vector.load %arg2[%c0_3, %c0_4, %c128] : memref<1x4x256xf32, #tpu.memory_space<vmem>>, vector<1x4x128xf32>
    %6 = vector.shape_cast %5 : vector<1x4x128xf32> to vector<4x128xf32>
    %7 = arith.addf %4, %6 : vector<4x128xf32>
    %c0_5 = arith.constant 0 : index
    %c0_6 = arith.constant 0 : index
    %8 = vector.load %arg6[%c0_5, %c0_6] : memref<4x128xf32, #tpu.memory_space<vmem>>, vector<4x128xf32>
    %9 = arith.addf %8, %7 : vector<4x128xf32>
    %c0_7 = arith.constant 0 : index
    %c0_8 = arith.constant 0 : index
    %10 = vector.load %arg6[%c0_7, %c0_8] : memref<4x128xf32, #tpu.memory_space<vmem>>, vector<4x128xf32>
    tpu.vector_store %arg6[%c0_7, %c0_8], %9 {strides = array<i32>} : memref<4x128xf32, #tpu.memory_space<vmem>>, vector<4x128xf32>,
    %c0_i32_9 = arith.constant 0 : i32
    %11 = arith.cmpi eq, %arg1, %c0_i32_9 : i32
    %12 = arith.extui %11 : i1 to i32
    %c0_i32_10 = arith.constant 0 : i32
    %13 = arith.cmpi ne, %12, %c0_i32_10 : i32
    scf.if %13 {
      %c0_11 = arith.constant 0 : index
      %c0_12 = arith.constant 0 : index
      %14 = vector.load %arg6[%c0_11, %c0_12] : memref<4x128xf32, #tpu.memory_space<vmem>>, vector<4x128xf32>
      %cst = arith.constant dense<0.000000e+00> : vector<4xf32>
      %15 = vector.multi_reduction <add>, %14, %cst [1] : vector<4x128xf32> to vector<4xf32>
      %16 = vector.shape_cast %15 : vector<4xf32> to vector<4x1xf32>
      %c0_13 = arith.constant 0 : index
      %c0_14 = arith.constant 0 : index
      %17 = vector.load %arg3[%c0_13, %c0_14] : memref<4x4xf32, #tpu.memory_space<vmem>>, vector<4x4xf32>
      %cst_15 = arith.constant dense<0.000000e+00> : vector<4x1xf32>
      %18 = tpu.matmul %17, %16, %cst_15 {dimension_numbers = #tpu.dot_dimension_numbers<[1], [0], [0], [1], [0, 0, 1, 1], [], []>} : vector<4x4xf32>, vector<4x1xf32>, vector<4x1xf32> -> vector<4x1xf32>
      %c0_16 = arith.constant 0 : index
      %c0_17 = arith.constant 0 : index
      %19 = vector.load %arg4[%c0_16, %c0_17] : memref<4x1xf32, #tpu.memory_space<vmem>>, vector<4x1xf32>
      %20 = arith.addf %18, %19 : vector<4x1xf32>
      %cst_18 = arith.constant 0.000000e+00 : f32
      %21 = vector.broadcast %cst_18 : f32 to vector<4x1xf32>
      %22 = arith.maximumf %20, %21 : vector<4x1xf32>
      %c0_19 = arith.constant 0 : index
      %c0_20 = arith.constant 0 : index
      %c0_21 = arith.constant 0 : index
      %23 = vector.load %arg5[%c0_19, %c0_20, %c0_21] : memref<1x4x1xf32, #tpu.memory_space<vmem>>, vector<1x4x1xf32>
      %24 = vector.shape_cast %23 : vector<1x4x1xf32> to vector<4x1xf32>
      %25 = vector.shape_cast %22 : vector<4x1xf32> to vector<1x4x1xf32>
      tpu.vector_store %arg5[%c0_19, %c0_20, %c0_21], %25 {strides = array<i32>} : memref<1x4x1xf32, #tpu.memory_space<vmem>>, vector<1x4x1xf32>,
    } else {
    }
    return
  }
  func.func @transform_0(%arg0: i32, %arg1: i32) -> (i32, i32, i32) {
    %c0_i32 = arith.constant 0 : i32
    %c0_i32_0 = arith.constant 0 : i32
    return %arg0, %c0_i32, %arg1 : i32, i32, i32
  }
  func.func @transform_1(%arg0: i32, %arg1: i32) -> (i32, i32) {
    %c0_i32 = arith.constant 0 : i32
    %c0_i32_0 = arith.constant 0 : i32
    %c0_i32_1 = arith.constant 0 : i32
    return %c0_i32, %c0_i32_0 : i32, i32
  }
  func.func @transform_2(%arg0: i32, %arg1: i32) -> (i32, i32) {
    %c0_i32 = arith.constant 0 : i32
    %c0_i32_0 = arith.constant 0 : i32
    %c0_i32_1 = arith.constant 0 : i32
    return %c0_i32, %c0_i32_0 : i32, i32
  }
  func.func @transform_3(%arg0: i32, %arg1: i32) -> (i32, i32, i32) {
    %c0_i32 = arith.constant 0 : i32
    %c0_i32_0 = arith.constant 0 : i32
    %c0_i32_1 = arith.constant 0 : i32
    return %arg0, %c0_i32, %c0_i32_0 : i32, i32, i32
  }
}

</mosaic_0001>

<bundles_post_ra>
// kernel: tpu_custom_call.1
= control target key start
LH: loop header
LB: loop body
LE: loop exit
PB: predicated region body
PF: predicated region fallthrough
CT: control target
= control target key end

     0   :  { %8 = vsyncpa [#allocation4], 0  ;;  %s696_s0 = inlined_call_operand.hbm [shape: f32[2,4,256], index: 0, kind: input, shape index: {}]   ;;  %s697_s1 = inlined_call_operand.vmem [shape: f32[4,4], index: 1, kind: input, shape index: {}]   ;;  %s698_s2 = inlined_call_operand.vmem [shape: f32[4,1], index: 2, kind: input, shape index: {}]   ;;  %s699_s3 = inlined_call_operand.vmem [shape: f32[2,4,1], index: 3, kind: output, shape index: {}]  }
   0x1   :  { %10 = vsyncpa [#allocation4 + $0x1], 0  ;;  %s565_s12 = smov 0   ;;  %s567_s13 = smov 0  }
   0x2   :  { %s569_s14 = smov 0   ;;  %s571_s15 = smov 0  }
   0x3   :  { %s573_s16 = smov 0   ;;  %s575_s17 = smov 0  }
   0x4 LB: > { %s381_s18 = sadd.s32 4294967295, %s540_s17   ;;  %s28_s19 = sadd.s32 1, %s536_s16  ;;  %s540_s17 = sphi %s575_s17, %s16_s17   ;;  %s536_s16 = sphi %s573_s16, %s709_s16   ;;  %s532_s15 = sphi %s571_s15, %s708_s15   ;;  %s528_s14 = sphi %s569_s14, %s707_s14   ;;  %s524_s13 = sphi %s567_s13, %s706_s13   ;;  %s520_s12 = sphi %s565_s12, %s705_s12  }
   0x5   : > { %p30_p0 = scmp.ge.s32.totalorder %s28_s19, 2  ;;  %s37_s20 = sadd.s32 1, %s528_s14 }
   0x6   : > { %p44_p1 = scmp.ne.s32.totalorder %s528_s14, %s524_s13  ;;  %p45_p2 = scmp.eq.s32.totalorder %s540_s17, 0 }
   0x7   : > { %s711_s19 = smov (%p30_p0, %s28_s19), 0  ;;  %p50_p4 = scmp.ne.s32.totalorder %s524_s13, %s520_s12 }
   0x8   : > { %p601_p3 = por %p45_p2, %p44_p1  ;;  %s32_s22 = ssub.s32 %s536_s16, %s711_s19 }
   0x9   : > { %p51_p5 = scmp.eq.s32.totalorder %s381_s18, 0  ;;  %p35_p6 = scmp.eq.s32.totalorder %s32_s22, 0 }
   0xa   : > { %p409_p8 = scmp.lt.s32.totalorder %s540_s17, 2  ;;  %s148_s25 = sand.u32 1, %s528_s14  }
   0xb   : > { %p608_p7 = por %p51_p5, %p50_p4  ;;  %s395_s26 = sshll.u32 %s536_s16, 7 }
   0xc   : > { %s614_s24 = scalar_select %p35_p6, %s528_s14, %s37_s20  }
   0xd   : > { %s385_s27 = sshll.u32 %s148_s25, 3  ;;  %s621_s30 = scalar_lea.hbm %s696_s0, %s395_s26 }
   0xe   : > { %s152_s4 = scalar_lea.vmem [#allocation3], %s385_s27  ;;  %p625_p9 = pnand %p409_p8, %p601_p3 }
   0xf   : > { %s162_s5 = sshll.u32 %s152_s4, 4  ;;  %s149_s7 = scalar_lea.sflag [#allocation4], %s148_s25  ;;  %s629_s5 = int_to_ptr.vmem [resolvable:$true] %s162_s5 }
  0x10   : > { %s460_s8 = scalar_lea.hbm %s621_s30, 128  ;;  %p462_p13 = pneg %p625_p9 }
  0x11   : > { %p461_p12 = scmp.ne.s32.totalorder %s621_s30, %s460_s8  ;;  %s465_s11 = scalar_lea.hbm %s696_s0, 256 }
  0x12   : > { %p466_p2 = scmp.lt.u32.totalorder %s621_s30, %s696_s0  ;;  %p467_p3 = scmp.lt.u32.totalorder %s465_s11, %s460_s8 }
  0x13   : > { %p463_p0 = pnand %p462_p13, %p461_p12  ;;  %p469_p5 = scmp.lt.u32.totalorder %s460_s8, %s621_s30 }
  0x14   : > { %p468_p4 = por %p467_p3, %p466_p2 }
  0x15   : > { %p464_p1 = pneg %p463_p0 }
  0x16   : > { %p470_p6 = por %p469_p5, %p468_p4 }
  0x18   : > { %p471_p8 = pnand %p470_p6, %p464_p1 }
  0x1a   : > { %474 = shalt.err (!%p471_p8)
}
  0x1b   : > { %s475_s20 = scalar_lea.vmem %s629_s5, 128  ;;  %s542_s21 = smov [#allocation3]  }
  0x1c   : > { %p476_p12 = scmp.ne.s32.totalorder %s629_s5, %s475_s20  ;;  %s480_s22 = sshll.u32 %s542_s21, 4  ;;  %s481_s22 = int_to_ptr.vmem [resolvable:$false] %s480_s22 }
  0x1d   : > { %s482_s25 = scalar_lea.vmem %s481_s22, 256  ;;  %p483_p11 = scmp.lt.s32.totalorder %s629_s5, %s481_s22 }
  0x1e   : > { %p478_p0 = pnand %p476_p12, %p462_p13  ;;  %p484_p2 = scmp.lt.s32.totalorder %s482_s25, %s475_s20 }
  0x20   : > { %p479_p10 = pneg %p478_p0  ;;  %p485_p3 = por %p484_p2, %p483_p11 }
  0x22   : > { %p486_p4 = pnand %p485_p3, %p479_p10 }
  0x24   : > { %489 = shalt.err (!%p486_p4)
}
  0x25   : > { %408 = dma.hbm_to_vmem [thread:$0]  (!%p625_p9), %s621_s30, 128, %s629_s5, %s149_s7  }
  0x26   : > { %p703_p1 = scmp.lt.s32.totalorder %s540_s17, 3  ;;  %p704_p5 = scmp.ge.s32.totalorder %s540_s17, 1 }
  0x28   : > { %p168_p13 = pnand %p704_p5, %p703_p1 }
  0x29   : > { %s173_s26 = sand.u32 (!%p168_p13), 1, %s524_s13  }
  0x2a   : > { %171 = sbr.rel (%p168_p13) target bundleno = 430 (0x1ae), region = 32  ;;  %s389_s27 = sshll.u32 (!%p168_p13), %s173_s26, 3 }
  0x2b   : > { %s174_s28 = scalar_lea.sflag (!%p168_p13), [#allocation4], %s173_s26  ;;  %s177_s29 = scalar_lea.vmem (!%p168_p13), [#allocation3], %s389_s27 }
  0x31   : > { %515 = dma.done.wait (%p608_p7), %s174_s28, 128  }
  0x32   : > { %517 = vsyncadd (%p608_p7), %s174_s28, 4294967168  ;;  %v543_v0 = vmov 0.0   ;;  %v209_v1 = vld [vmem:[%s177_s29] sm:$0xf]  ;;  %v210_v2 = vld [vmem:[%s177_s29 + $0x4] sm:$0xf] }
  0x33   : > { %208 = vst [vmem:[#allocation2] sm:$0xf] %v543_v0  ;;  %398 = vmatprep.subr.mxu0 %v543_v0  ;;  %v211_v3 = vadd.f32 %v210_v2, %v209_v1  ;;  %vm219_vm0 = vcmask 1043456   ;;  %vm544_vm1 = vmmov 0   ;;  %v223_v8 = vld [vmem:[%s697_s1] sm:$0xf] }
  0x34   : > { %400 = vmatprep.mubr.msk.f32.mxu0 %vm544_vm1, %v543_v0  ;;  %vm225_vm2 = vcmask 31744   ;;  %p200_p7 = scmp.lt.s32.totalorder %s532_s15, 1  ;;  %v224_v10 = vld [vmem:[%s698_s2] sm:$0xf]  ;;  %vm303_vm3 = vcmask 3072  }
  0x36   : > { %s713_s15 = smov (!%p200_p7, %s532_s15), 1 }
  0x37   : > { %s390_s6 = sshll.u32 %s713_s15, 2 }
  0x38   : > { %s203_s9 = scalar_lea.vmem %s699_s3, %s390_s6 }
  0x3a   : > { %v212_v4 = vld [vmem:[#allocation2] sm:$0xf] }
  0x3b   : > { %v213_v5 = vadd.f32 %v212_v4, %v211_v3 }
  0x3d   : > { %214 = vst [vmem:[#allocation2] sm:$0xf] %v213_v5 }
  0x44   : > { %v218_v6 = vld [vmem:[#allocation2] sm:$0xf] }
  0x45   : > { %v220_v7 = vsel %vm219_vm0, %v218_v6, 0.0 }
  0x46   : > { %221 = vadd.xlane.f32.xlu0 %v220_v7 }
  0xd3   : > { %v222_v9 = vpop.xlane.xlu0 %221 }
  0xd4   : > { %399 = vmatpush3.msk.msra.mxu0 %vm219_vm0, %v222_v9 }
  0xd5   : > { %401 = vmatmul.mubr.msk.f32.vlgmr.msra.gmra.mrb[0].mxu0 %vm225_vm2, %v223_v8 }
 0x1a8   : > { %v298_v11 = vpop.f32.mrb[0].mxu0 }
 0x1a9   : > { %v299_v12 = vadd.f32 %v298_v11, %v224_v10  ;;  %v402_v13 = vpop.f32.mrb[1].mxu0 }
 0x1ab   : > { %v302_v14 = vmax.f32 %v299_v12, 0.0 }
 0x1ad   : > { %304 = vst.msk [vmem:[%s203_s9] sm:$0xf] %vm303_vm3, %v302_v14 }
 0x1ae PF: > { %s16_s17 = sadd.s32 1, %s540_s17   ;;  %s705_s12 = smov %s524_s13 }
 0x1af   : > { %p13_p9 = scmp.ge.s32.totalorder %s16_s17, 4   ;;  %s706_s13 = smov %s528_s14 }
 0x1b0   : > { %s707_s14 = smov %s614_s24  ;;  %s708_s15 = smov %s536_s16 }
 0x1b1   : > { %s709_s16 = smov %s711_s19  ;;  %15 = sbr.rel (!%p13_p9) target bundleno = 4 (0x4), region = 80 }
 0x1b8   :  { %324 = vsyncpa [#allocation4], 1 }
 0x1b9   :  { %326 = vsyncpa [#allocation4 + $0x1], 1 }

</bundles_post_ra>
